<compile_context>
chip_gen: v7x
topology: tpu7x:2x2x1
jax: 0.10.0
libtpu: 0.0.40
codegen_flags: <defaults>
</compile_context>

<pallas_src>
import numpy as np
import jax
import jax.numpy as jnp
from jax.experimental import pallas as pl
from jax.experimental.pallas import tpu as pltpu


# ---------------------------------------------------------------------------
# Exact PyTorch AdaptiveAvgPool2d / bilinear(align_corners=True) as tiny
# spatial matrices (pure data movement, built once in numpy).
# ---------------------------------------------------------------------------
def _adaptive_pool_matrix(in_len: int, out_len: int) -> jnp.ndarray:
    P = np.zeros((out_len, in_len), dtype=np.float32)
    for i in range(out_len):
        start = (i * in_len) // out_len
        end = -(-((i + 1) * in_len) // out_len)  # ceil
        P[i, start:end] = 1.0 / (end - start)
    return jnp.asarray(P)


def _bilinear_up_matrix(out_len: int, in_len: int) -> jnp.ndarray:
    U = np.zeros((out_len, in_len), dtype=np.float32)
    if in_len == 1:
        U[:, 0] = 1.0
        return jnp.asarray(U)
    scale = (in_len - 1) / (out_len - 1) if out_len > 1 else 0.0
    for h in range(out_len):
        src = h * scale
        i0 = min(int(np.floor(src)), in_len - 1)
        i1 = min(i0 + 1, in_len - 1)
        frac = src - i0
        U[h, i0] += 1.0 - frac
        U[h, i1] += frac
    return jnp.asarray(U)


def _round_up(n: int, m: int) -> int:
    return ((n + m - 1) // m) * m


def _pick_k_tile(k: int, candidates=(1024, 512, 256, 128)) -> int:
    """Largest lane-aligned tile that divides K; fall back to whole K."""
    for t in candidates:
        if k >= t and k % t == 0:
            return t
    return k


# ---------------------------------------------------------------------------
# Pallas kernel: identity-branch 1x1 conv (K-tiled matmul, f32 accumulator)
# + pooled-branch partial sum Z + bias + ReLU.
# ---------------------------------------------------------------------------
def _bottleneck_kernel(x_ref, w_ref, z_ref, b_ref, o_ref, acc_ref):
    k = pl.program_id(1)

    @pl.when(k == 0)
    def _init():
        acc_ref[...] = jnp.zeros_like(acc_ref)

    acc_ref[...] += jnp.dot(x_ref[...], w_ref[...],
                            preferred_element_type=jnp.float32)

    @pl.when(k == pl.num_programs(1) - 1)
    def _finalize():
        y = (acc_ref[...]
             + z_ref[...].astype(jnp.float32)
             + b_ref[...].astype(jnp.float32))
        o_ref[...] = jnp.maximum(y, 0.0).astype(o_ref.dtype)


def bottleneck_relu_pallas(x_rows, w, z_rows, bias, out_dtype, tile_m=512):
    """ReLU(x_rows @ w + z_rows + bias).

    x_rows: (M, K) identity-branch activations (channel-last rows)
    w:      (K, F) identity-branch slice of the bottleneck weight (F lane-dense)
    z_rows: (M, F) summed pooled-branch bottleneck contributions
    bias:   (F,)   f32 bias
    """
    M, K = x_rows.shape
    Kw, F = w.shape
    assert Kw == K and z_rows.shape == (M, F) and bias.shape == (F,)
    assert F % 128 == 0, "output channels must be padded lane-dense (x128)"

    tile_m = max(8, min(tile_m, _round_up(M, 8)))   # don't over-allocate VMEM
    tk = _pick_k_tile(K)
    num_m = pl.cdiv(M, tile_m)                      # ragged last M block is OK
    num_k = K // tk

    in_bytes = x_rows.dtype.itemsize
    out_bytes = jnp.dtype(out_dtype).itemsize
    # double-buffered X/W/Z + double-buffered out + f32 acc scratch + bias
    vmem_est = (2 * (tile_m * tk + tk * F + tile_m * F) * in_bytes
                + 2 * tile_m * F * out_bytes
                + tile_m * F * 4 + 2 * F * 4)
    # Raise scoped-VMEM ceiling when needed, but stay within v7x's 64 MiB phys.
    vmem_limit = int(min(max(2 * vmem_est, 32 * 1024 * 1024), 64 * 1024 * 1024))

    grid_spec = pltpu.PrefetchScalarGridSpec(
        num_scalar_prefetch=0,
        grid=(num_m, num_k),                        # reduction axis last
        in_specs=[
            pl.BlockSpec((tile_m, tk), lambda i, k: (i, k)),   # X tile
            pl.BlockSpec((tk, F), lambda i, k: (k, 0)),        # W tile
            pl.BlockSpec((tile_m, F), lambda i, k: (i, 0)),    # Z (const in k)
            pl.BlockSpec((1, F), lambda i, k: (0, 0)),         # bias
        ],
        out_specs=pl.BlockSpec((tile_m, F), lambda i, k: (i, 0)),
        scratch_shapes=[pltpu.VMEM((tile_m, F), jnp.float32)],
    )
    return pl.pallas_call(
        _bottleneck_kernel,
        out_shape=jax.ShapeDtypeStruct((M, F), out_dtype),
        grid_spec=grid_spec,
        compiler_params=pltpu.CompilerParams(
            dimension_semantics=("parallel", "arbitrary"),
            vmem_limit_bytes=vmem_limit),
    )(x_rows, w, z_rows, bias.reshape(1, F))


# ---------------------------------------------------------------------------
# PSPModule forward
# ---------------------------------------------------------------------------
def psp_module_forward(feats, params, sizes=(1, 2, 3, 6),
                       compute_dtype=jnp.bfloat16, tile_m=512):
    """feats: (N, C, H, W) NCHW -> (N, out_features, H, W) NCHW."""
    N, C, H, W = feats.shape
    Wb = params['bottleneck_w']                 # (F, (len(sizes)+1)*C)
    bb = params['bottleneck_b']                 # (F,)
    F_out = Wb.shape[0]
    F_pad = _round_up(F_out, 128)               # lane-dense output channels
    pad_f = F_pad - F_out

    # Split bottleneck weight into per-branch chunks (concat order: p1..p4,
    # feats); zero-pad output channels so the Pallas stores are unmasked.
    chunks = [Wb[:, i * C:(i + 1) * C] for i in range(len(sizes) + 1)]
    if pad_f:
        chunks = [jnp.pad(c, ((0, pad_f), (0, 0))) for c in chunks]
        bias = jnp.pad(bb, (0, pad_f)).astype(jnp.float32)
    else:
        bias = bb.astype(jnp.float32)

    # Pooled branches: apply (bottleneck-chunk @ stage-conv) on the tiny s x s
    # grid, then bilinear-upsample the F_pad-channel result (all ops are
    # linear 1x1 convs / spatial matrices, so they commute). Accumulate the
    # channel-last partial sum Z that the kernel adds before bias+ReLU.
    z = None
    for idx, s in enumerate(sizes):
        Ph = _adaptive_pool_matrix(H, s)
        Pw = _adaptive_pool_matrix(W, s)
        pooled = jnp.einsum('sh,nchw,tw->ncst', Ph, feats, Pw)      # (N,C,s,s)
        fused_w = chunks[idx] @ params['stage_w'][idx]              # (F_pad,C)
        y_small = jnp.einsum('fc,ncst->nfst', fused_w, pooled)      # (N,F_pad,s,s)
        Uh = _bilinear_up_matrix(H, s)
        Uw = _bilinear_up_matrix(W, s)
        contrib = jnp.einsum('hs,nfst,wt->nhwf', Uh, y_small, Uw)   # (N,H,W,F_pad)
        z = contrib if z is None else z + contrib

    M = N * H * W
    x_rows = (jnp.transpose(feats, (0, 2, 3, 1))
              .reshape(M, C).astype(compute_dtype))
    z_rows = z.reshape(M, F_pad).astype(compute_dtype)
    w_id = chunks[-1].T.astype(compute_dtype)                       # (C, F_pad)

    y = bottleneck_relu_pallas(x_rows, w_id, z_rows, bias,
                               out_dtype=feats.dtype, tile_m=tile_m)
    y = y[:, :F_out].reshape(N, H, W, F_out)
    return jnp.transpose(y, (0, 3, 1, 2))                           # NCHW


def _reference_forward(feats, params, sizes=(1, 2, 3, 6)):
    """Pure-JAX reference: literal concat-then-1x1-conv path (all f32)."""
    N, C, H, W = feats.shape
    branches = []
    for idx, s in enumerate(sizes):
        Ph = _adaptive_pool_matrix(H, s)
        Pw = _adaptive_pool_matrix(W, s)
        pooled = jnp.einsum('sh,nchw,tw->ncst', Ph, feats, Pw)
        conved = jnp.einsum('oc,ncst->nost', params['stage_w'][idx], pooled)
        Uh = _bilinear_up_matrix(H, s)
        Uw = _bilinear_up_matrix(W, s)
        branches.append(jnp.einsum('hs,ncst,wt->nchw', Uh, conved, Uw))
    branches.append(feats)
    x = jnp.concatenate(branches, axis=1)
    y = jnp.einsum('oc,nchw->nohw', params['bottleneck_w'], x)
    y = y + params['bottleneck_b'][None, :, None, None]
    return jnp.maximum(y, 0.0)


if __name__ == "__main__":
    # Small shapes consistent with the module: NCHW input, sizes (1,2,3,6)
    N, C, H, W = 2, 4, 16, 16
    OUT_FEATURES = 32
    SIZES = (1, 2, 3, 6)

    key = jax.random.PRNGKey(0)
    k_x, k_s, k_w, k_b = jax.random.split(key, 4)

    feats = jax.random.normal(k_x, (N, C, H, W), dtype=jnp.float32)

    stage_keys = jax.random.split(k_s, len(SIZES))
    params = {
        # per-stage Conv2d(C, C, 1, bias=False) -> weight (C, C)
        'stage_w': [
            0.1 * jax.random.normal(stage_keys[i], (C, C), dtype=jnp.float32)
            for i in range(len(SIZES))
        ],
        # bottleneck Conv2d(5C, OUT, 1) -> weight (OUT, 5C), bias (OUT,)
        'bottleneck_w': 0.1 * jax.random.normal(
            k_w, (OUT_FEATURES, C * (len(SIZES) + 1)), dtype=jnp.float32),
        'bottleneck_b': 0.1 * jax.random.normal(
            k_b, (OUT_FEATURES,), dtype=jnp.float32),
    }

    ref = jax.block_until_ready(_reference_forward(feats, params, SIZES))

    # 1) f32 compute path: strict semantics check against the reference.
    out_f32 = jax.block_until_ready(
        psp_module_forward(feats, params, SIZES, compute_dtype=jnp.float32))
    assert out_f32.shape == (N, OUT_FEATURES, H, W)
    np.testing.assert_allclose(np.asarray(out_f32), np.asarray(ref),
                               rtol=1e-4, atol=1e-4)

    # 2) Default fast path: bf16 MXU inputs, f32 accumulation.
    out_bf16 = jax.block_until_ready(psp_module_forward(feats, params, SIZES))
    assert out_bf16.shape == (N, OUT_FEATURES, H, W)
    np.testing.assert_allclose(np.asarray(out_bf16), np.asarray(ref),
                               rtol=3e-2, atol=3e-2)

    print("KERNEL_OK")
</pallas_src>

<mosaic_0001>
module attributes {stable_mosaic.version = 11 : i64} {
  func.func @_bottleneck_kernel(%arg0: i32, %arg1: i32, %arg2: memref<512x4xf32, #tpu.memory_space<vmem>>, %arg3: memref<4x128xf32, #tpu.memory_space<vmem>>, %arg4: memref<512x128xf32, #tpu.memory_space<vmem>>, %arg5: memref<1x128xf32, #tpu.memory_space<vmem>>, %arg6: memref<512x128xf32, #tpu.memory_space<vmem>>, %arg7: memref<512x128xf32, #tpu.memory_space<vmem>>) attributes {dimension_semantics = [#tpu.dimension_semantics<parallel>, #tpu.dimension_semantics<arbitrary>], iteration_bounds = array<i64: 1, 1>, scalar_prefetch = 0 : i64, scratch_operands = 1 : i64, tpu.core_type = #tpu.core_type<tc>, window_params = [{transform_indices = @transform_0, window_bounds = array<i64: 512, 4>}, {transform_indices = @transform_1, window_bounds = array<i64: 4, 128>}, {transform_indices = @transform_2, window_bounds = array<i64: 512, 128>}, {pipeline_mode = #tpu.pipeline_mode<synchronous>, transform_indices = @transform_3, window_bounds = array<i64: 1, 128>}, {transform_indices = @transform_4, window_bounds = array<i64: 512, 128>}]} {
    %c0_i32 = arith.constant 0 : i32
    %0 = arith.cmpi eq, %arg1, %c0_i32 : i32
    %1 = arith.extui %0 : i1 to i32
    %c0_i32_0 = arith.constant 0 : i32
    %2 = arith.cmpi ne, %1, %c0_i32_0 : i32
    scf.if %2 {
      %cst_10 = arith.constant 0.000000e+00 : f32
      %12 = vector.broadcast %cst_10 : f32 to vector<512x128xf32>
      %c0_11 = arith.constant 0 : index
      %c0_12 = arith.constant 0 : index
      %13 = vector.load %arg7[%c0_11, %c0_12] : memref<512x128xf32, #tpu.memory_space<vmem>>, vector<512x128xf32>
      tpu.vector_store %arg7[%c0_11, %c0_12], %12 {strides = array<i32>} : memref<512x128xf32, #tpu.memory_space<vmem>>, vector<512x128xf32>,
    } else {
    }
    %c0 = arith.constant 0 : index
    %c0_1 = arith.constant 0 : index
    %3 = vector.load %arg7[%c0, %c0_1] : memref<512x128xf32, #tpu.memory_space<vmem>>, vector<512x128xf32>
    %c0_2 = arith.constant 0 : index
    %c0_3 = arith.constant 0 : index
    %4 = vector.load %arg2[%c0_2, %c0_3] : memref<512x4xf32, #tpu.memory_space<vmem>>, vector<512x4xf32>
    %c0_4 = arith.constant 0 : index
    %c0_5 = arith.constant 0 : index
    %5 = vector.load %arg3[%c0_4, %c0_5] : memref<4x128xf32, #tpu.memory_space<vmem>>, vector<4x128xf32>
    %cst = arith.constant dense<0.000000e+00> : vector<512x128xf32>
    %6 = tpu.matmul %4, %5, %cst {dimension_numbers = #tpu.dot_dimension_numbers<[1], [0], [0], [1], [0, 0, 1, 1], [], []>} : vector<512x4xf32>, vector<4x128xf32>, vector<512x128xf32> -> vector<512x128xf32>
    %7 = arith.addf %3, %6 : vector<512x128xf32>
    %c0_6 = arith.constant 0 : index
    %c0_7 = arith.constant 0 : index
    %8 = vector.load %arg7[%c0_6, %c0_7] : memref<512x128xf32, #tpu.memory_space<vmem>>, vector<512x128xf32>
    tpu.vector_store %arg7[%c0_6, %c0_7], %7 {strides = array<i32>} : memref<512x128xf32, #tpu.memory_space<vmem>>, vector<512x128xf32>,
    %c0_i32_8 = arith.constant 0 : i32
    %9 = arith.cmpi eq, %arg1, %c0_i32_8 : i32
    %10 = arith.extui %9 : i1 to i32
    %c0_i32_9 = arith.constant 0 : i32
    %11 = arith.cmpi ne, %10, %c0_i32_9 : i32
    scf.if %11 {
      %c0_10 = arith.constant 0 : index
      %c0_11 = arith.constant 0 : index
      %12 = vector.load %arg7[%c0_10, %c0_11] : memref<512x128xf32, #tpu.memory_space<vmem>>, vector<512x128xf32>
      %c0_12 = arith.constant 0 : index
      %c0_13 = arith.constant 0 : index
      %13 = vector.load %arg4[%c0_12, %c0_13] : memref<512x128xf32, #tpu.memory_space<vmem>>, vector<512x128xf32>
      %14 = arith.addf %12, %13 : vector<512x128xf32>
      %c0_14 = arith.constant 0 : index
      %c0_15 = arith.constant 0 : index
      %15 = vector.load %arg5[%c0_14, %c0_15] : memref<1x128xf32, #tpu.memory_space<vmem>>, vector<1x128xf32>
      %16 = vector.broadcast %15 : vector<1x128xf32> to vector<512x128xf32>
      %17 = arith.addf %14, %16 : vector<512x128xf32>
      %cst_16 = arith.constant 0.000000e+00 : f32
      %18 = vector.broadcast %cst_16 : f32 to vector<512x128xf32>
      %19 = arith.maximumf %17, %18 : vector<512x128xf32>
      %c0_17 = arith.constant 0 : index
      %c0_18 = arith.constant 0 : index
      %20 = vector.load %arg6[%c0_17, %c0_18] : memref<512x128xf32, #tpu.memory_space<vmem>>, vector<512x128xf32>
      tpu.vector_store %arg6[%c0_17, %c0_18], %19 {strides = array<i32>} : memref<512x128xf32, #tpu.memory_space<vmem>>, vector<512x128xf32>,
    } else {
    }
    return
  }
  func.func @transform_0(%arg0: i32, %arg1: i32) -> (i32, i32) {
    %c0_i32 = arith.constant 0 : i32
    return %arg0, %arg1 : i32, i32
  }
  func.func @transform_1(%arg0: i32, %arg1: i32) -> (i32, i32) {
    %c0_i32 = arith.constant 0 : i32
    %c0_i32_0 = arith.constant 0 : i32
    return %arg1, %c0_i32 : i32, i32
  }
  func.func @transform_2(%arg0: i32, %arg1: i32) -> (i32, i32) {
    %c0_i32 = arith.constant 0 : i32
    %c0_i32_0 = arith.constant 0 : i32
    return %arg0, %c0_i32 : i32, i32
  }
  func.func @transform_3(%arg0: i32, %arg1: i32) -> (i32, i32) {
    %c0_i32 = arith.constant 0 : i32
    %c0_i32_0 = arith.constant 0 : i32
    %c0_i32_1 = arith.constant 0 : i32
    return %c0_i32, %c0_i32_0 : i32, i32
  }
  func.func @transform_4(%arg0: i32, %arg1: i32) -> (i32, i32) {
    %c0_i32 = arith.constant 0 : i32
    %c0_i32_0 = arith.constant 0 : i32
    return %arg0, %c0_i32 : i32, i32
  }
}

</mosaic_0001>

<bundles_post_ra>
// kernel: tpu_custom_call.1
= control target key start
LH: loop header
LB: loop body
LE: loop exit
PB: predicated region body
PF: predicated region fallthrough
CT: control target
= control target key end

     0   :  { %vm408_vm0 = vcmask 1043456   ;;  %vm215_vm1 = vcmask 31744   ;;  %s2153_s0 = inlined_call_operand.vmem [shape: f32[512,4], index: 0, kind: input, shape index: {}]   ;;  %s2154_s1 = inlined_call_operand.vmem [shape: f32[4,128], index: 1, kind: input, shape index: {}]   ;;  %s2155_s2 = inlined_call_operand.vmem [shape: f32[512,128], index: 2, kind: input, shape index: {}]   ;;  %s2156_s3 = inlined_call_operand.vmem [shape: f32[1,128], index: 3, kind: input, shape index: {}]   ;;  %s2157_s4 = inlined_call_operand.hbm [shape: f32[512,128], index: 4, kind: output, shape index: {}]  }
   0x1   :  { %v214_v0 = vld [vmem:[%s2154_s1] sm:$0xf]  ;;  %v151_v3 = vld [vmem:[%s2153_s0 + $0x8] sm:$0xff]  ;;  %v152_v5 = vld [vmem:[%s2153_s0 + $0x10] sm:$0xff] }
   0x2   :  { %v150_v1 = vld [vmem:[%s2153_s0] sm:$0xff]  ;;  %1466 = vmatprep.subr.msk.mxu0 %vm408_vm0, %v214_v0  ;;  %1564 = vmatprep.subr.msk.mxu1 %vm408_vm0, %v214_v0  ;;  %v183_v4 = vld [vmem:[%s2153_s0 + $0x108] sm:$0xff]  ;;  %v184_v6 = vld [vmem:[%s2153_s0 + $0x110] sm:$0xff] }
   0x3   :  { %v182_v2 = vld [vmem:[%s2153_s0 + $0x100] sm:$0xff]  ;;  %1467 = vmatpush3.msk.msra.mxu0 %vm408_vm0, %v214_v0  ;;  %1565 = vmatpush3.msk.msra.mxu1 %vm408_vm0, %v214_v0  ;;  %v153_v7 = vld [vmem:[%s2153_s0 + $0x18] sm:$0xff]  ;;  %v155_v11 = vld [vmem:[%s2153_s0 + $0x28] sm:$0xff] }
   0x4   :  { %1468 = vmatprep.mubr.msk.f32.mxu0 %vm215_vm1, %v150_v1  ;;  %1516 = vmatprep.mubr.msk.f32.mxu1 %vm215_vm1, %v182_v2  ;;  %v185_v8 = vld [vmem:[%s2153_s0 + $0x118] sm:$0xff]  ;;  %v154_v9 = vld [vmem:[%s2153_s0 + $0x20] sm:$0xff]  ;;  %v187_v12 = vld [vmem:[%s2153_s0 + $0x128] sm:$0xff] }
   0x5   :  { %1469 = vmatmul.mubr.msk.f32.vlgmr.msra.gmra.mrb[0].mxu0 %vm215_vm1, %v151_v3  ;;  %1517 = vmatmul.mubr.msk.f32.vlgmr.msra.gmra.mrb[0].mxu1 %vm215_vm1, %v183_v4  ;;  %v186_v10 = vld [vmem:[%s2153_s0 + $0x120] sm:$0xff]  ;;  %v156_v13 = vld [vmem:[%s2153_s0 + $0x30] sm:$0xff]  ;;  %v157_v15 = vld [vmem:[%s2153_s0 + $0x38] sm:$0xff] }
   0x6   :  { %1471 = vmatprep.mubr.msk.f32.mxu0 %vm215_vm1, %v152_v5  ;;  %1519 = vmatprep.mubr.msk.f32.mxu1 %vm215_vm1, %v184_v6  ;;  %v188_v14 = vld [vmem:[%s2153_s0 + $0x130] sm:$0xff]  ;;  %v189_v16 = vld [vmem:[%s2153_s0 + $0x138] sm:$0xff]  ;;  %v158_v17 = vld [vmem:[%s2153_s0 + $0x40] sm:$0xff] }
   0x7   :  { %v190_v18 = vld [vmem:[%s2153_s0 + $0x140] sm:$0xff]  ;;  %v159_v19 = vld [vmem:[%s2153_s0 + $0x48] sm:$0xff]  ;;  %v160_v21 = vld [vmem:[%s2153_s0 + $0x50] sm:$0xff] }
   0x8   :  { %v191_v20 = vld [vmem:[%s2153_s0 + $0x148] sm:$0xff]  ;;  %v192_v22 = vld [vmem:[%s2153_s0 + $0x150] sm:$0xff]  ;;  %v161_v23 = vld [vmem:[%s2153_s0 + $0x58] sm:$0xff] }
   0x9   :  { %1472 = vmatmul.mubr.msk.f32.gmra.mrb[2].mxu0 %vm215_vm1, %v153_v7  ;;  %1520 = vmatmul.mubr.msk.f32.gmra.mrb[2].mxu1 %vm215_vm1, %v185_v8  ;;  %v193_v24 = vld [vmem:[%s2153_s0 + $0x158] sm:$0xff] }
   0xa   :  { %1474 = vmatprep.mubr.msk.f32.mxu0 %vm215_vm1, %v154_v9  ;;  %1522 = vmatprep.mubr.msk.f32.mxu1 %vm215_vm1, %v186_v10 }
   0xd   :  { %1475 = vmatmul.mubr.msk.f32.gmra.mrb[4].mxu0 %vm215_vm1, %v155_v11  ;;  %1523 = vmatmul.mubr.msk.f32.gmra.mrb[4].mxu1 %vm215_vm1, %v187_v12 }
   0xe   :  { %1477 = vmatprep.mubr.msk.f32.mxu0 %vm215_vm1, %v156_v13  ;;  %1525 = vmatprep.mubr.msk.f32.mxu1 %vm215_vm1, %v188_v14 }
  0x11   :  { %1478 = vmatmul.mubr.msk.f32.gmra.mrb[6].mxu0 %vm215_vm1, %v157_v15  ;;  %1526 = vmatmul.mubr.msk.f32.gmra.mrb[6].mxu1 %vm215_vm1, %v189_v16 }
  0x12   :  { %1480 = vmatprep.mubr.msk.f32.mxu0 %vm215_vm1, %v158_v17  ;;  %1528 = vmatprep.mubr.msk.f32.mxu1 %vm215_vm1, %v190_v18 }
  0x15   :  { %1481 = vmatmul.mubr.msk.f32.gmra.mrb[8].mxu0 %vm215_vm1, %v159_v19  ;;  %1529 = vmatmul.mubr.msk.f32.gmra.mrb[8].mxu1 %vm215_vm1, %v191_v20 }
  0x16   :  { %1483 = vmatprep.mubr.msk.f32.mxu0 %vm215_vm1, %v160_v21  ;;  %1531 = vmatprep.mubr.msk.f32.mxu1 %vm215_vm1, %v192_v22 }
  0x17   :  { %9 = vsyncpa [#allocation4], 0  ;;  %v162_v25 = vld [vmem:[%s2153_s0 + $0x60] sm:$0xff]  ;;  %v163_v27 = vld [vmem:[%s2153_s0 + $0x68] sm:$0xff] }
  0x18   :  { %v194_v26 = vld [vmem:[%s2153_s0 + $0x160] sm:$0xff]  ;;  %v195_v28 = vld [vmem:[%s2153_s0 + $0x168] sm:$0xff]  ;;  %v164_v29 = vld [vmem:[%s2153_s0 + $0x70] sm:$0xff] }
  0x19   :  { %1484 = vmatmul.mubr.msk.f32.gmra.mrb[10].mxu0 %vm215_vm1, %v161_v23  ;;  %1532 = vmatmul.mubr.msk.f32.gmra.mrb[10].mxu1 %vm215_vm1, %v193_v24  ;;  %v196_v30 = vld [vmem:[%s2153_s0 + $0x170] sm:$0xff]  ;;  %v165_v31 = vld [vmem:[%s2153_s0 + $0x78] sm:$0xff]  ;;  %v166_v33 = vld [vmem:[%s2153_s0 + $0x80] sm:$0xff] }
  0x1a   :  { %1486 = vmatprep.mubr.msk.f32.mxu0 %vm215_vm1, %v162_v25  ;;  %1534 = vmatprep.mubr.msk.f32.mxu1 %vm215_vm1, %v194_v26  ;;  %v197_v32 = vld [vmem:[%s2153_s0 + $0x178] sm:$0xff]  ;;  %v198_v34 = vld [vmem:[%s2153_s0 + $0x180] sm:$0xff]  ;;  %v167_v35 = vld [vmem:[%s2153_s0 + $0x88] sm:$0xff] }
  0x1b   :  { %v199_v36 = vld [vmem:[%s2153_s0 + $0x188] sm:$0xff]  ;;  %v168_v37 = vld [vmem:[%s2153_s0 + $0x90] sm:$0xff]  ;;  %v169_v39 = vld [vmem:[%s2153_s0 + $0x98] sm:$0xff] }
  0x1c   :  { %v200_v38 = vld [vmem:[%s2153_s0 + $0x190] sm:$0xff]  ;;  %v201_v40 = vld [vmem:[%s2153_s0 + $0x198] sm:$0xff]  ;;  %v170_v41 = vld [vmem:[%s2153_s0 + $0xa0] sm:$0xff] }
  0x1d   :  { %1487 = vmatmul.mubr.msk.f32.gmra.mrb[12].mxu0 %vm215_vm1, %v163_v27  ;;  %1535 = vmatmul.mubr.msk.f32.gmra.mrb[12].mxu1 %vm215_vm1, %v195_v28  ;;  %v202_v42 = vld [vmem:[%s2153_s0 + $0x1a0] sm:$0xff]  ;;  %v171_v43 = vld [vmem:[%s2153_s0 + $0xa8] sm:$0xff]  ;;  %v172_v45 = vld [vmem:[%s2153_s0 + $0xb0] sm:$0xff] }
  0x1e   :  { %1489 = vmatprep.mubr.msk.f32.mxu0 %vm215_vm1, %v164_v29  ;;  %1537 = vmatprep.mubr.msk.f32.mxu1 %vm215_vm1, %v196_v30  ;;  %v203_v44 = vld [vmem:[%s2153_s0 + $0x1a8] sm:$0xff]  ;;  %v204_v46 = vld [vmem:[%s2153_s0 + $0x1b0] sm:$0xff]  ;;  %v173_v47 = vld [vmem:[%s2153_s0 + $0xb8] sm:$0xff] }
  0x1f   :  { %v205_v48 = vld [vmem:[%s2153_s0 + $0x1b8] sm:$0xff]  ;;  %v174_v49 = vld [vmem:[%s2153_s0 + $0xc0] sm:$0xff]  ;;  %v175_v51 = vld [vmem:[%s2153_s0 + $0xc8] sm:$0xff] }
  0x20   :  { %v206_v50 = vld [vmem:[%s2153_s0 + $0x1c0] sm:$0xff]  ;;  %v207_v52 = vld [vmem:[%s2153_s0 + $0x1c8] sm:$0xff]  ;;  %v176_v53 = vld [vmem:[%s2153_s0 + $0xd0] sm:$0xff] }
  0x21   :  { %1490 = vmatmul.mubr.msk.f32.gmra.mrb[14].mxu0 %vm215_vm1, %v165_v31  ;;  %1538 = vmatmul.mubr.msk.f32.gmra.mrb[14].mxu1 %vm215_vm1, %v197_v32  ;;  %v208_v54 = vld [vmem:[%s2153_s0 + $0x1d0] sm:$0xff]  ;;  %v177_v55 = vld [vmem:[%s2153_s0 + $0xd8] sm:$0xff]  ;;  %v178_v57 = vld [vmem:[%s2153_s0 + $0xe0] sm:$0xff] }
  0x22   :  { %1492 = vmatprep.mubr.msk.f32.mxu0 %vm215_vm1, %v166_v33  ;;  %1540 = vmatprep.mubr.msk.f32.mxu1 %vm215_vm1, %v198_v34  ;;  %v209_v56 = vld [vmem:[%s2153_s0 + $0x1d8] sm:$0xff]  ;;  %v210_v58 = vld [vmem:[%s2153_s0 + $0x1e0] sm:$0xff]  ;;  %v179_v59 = vld [vmem:[%s2153_s0 + $0xe8] sm:$0xff] }
  0x23   :  { %v211_v60 = vld [vmem:[%s2153_s0 + $0x1e8] sm:$0xff]  ;;  %v180_v61 = vld [vmem:[%s2153_s0 + $0xf0] sm:$0xff]  ;;  %v181_v63 = vld [vmem:[%s2153_s0 + $0xf8] sm:$0xff] }
  0x24   :  { %v212_v62 = vld [vmem:[%s2153_s0 + $0x1f0] sm:$0xff]  ;;  %v213_v0 = vld [vmem:[%s2153_s0 + $0x1f8] sm:$0xff]  ;;  %v993_v1 = vld [vmem:[%s2155_s2 + $0x8] sm:$0xff] }
  0x25   :  { %1493 = vmatmul.mubr.msk.f32.gmra.mrb[16].mxu0 %vm215_vm1, %v167_v35  ;;  %1541 = vmatmul.mubr.msk.f32.gmra.mrb[16].mxu1 %vm215_vm1, %v199_v36  ;;  %v1025_v2 = vld [vmem:[%s2155_s2 + $0x108] sm:$0xff]  ;;  %v992_v3 = vld [vmem:[%s2155_s2] sm:$0xff]  ;;  %v995_v14 = vld [vmem:[%s2155_s2 + $0x18] sm:$0xff] }
  0x26   :  { %1495 = vmatprep.mubr.msk.f32.mxu0 %vm215_vm1, %v168_v37  ;;  %1543 = vmatprep.mubr.msk.f32.mxu1 %vm215_vm1, %v200_v38  ;;  %v1024_v4 = vld [vmem:[%s2155_s2 + $0x100] sm:$0xff]  ;;  %v1027_v15 = vld [vmem:[%s2155_s2 + $0x118] sm:$0xff]  ;;  %v994_v18 = vld [vmem:[%s2155_s2 + $0x10] sm:$0xff] }
  0x27   :  { %v1895_v6 = vld [vmem:[%s2156_s3] ss:$0 sm:$0xff]  ;;  %v1026_v19 = vld [vmem:[%s2155_s2 + $0x110] sm:$0xff]  ;;  %v997_v34 = vld [vmem:[%s2155_s2 + $0x28] sm:$0xff]  ;;  %s1593_s3 = smov [#allocation3]  }
  0x28   :  { %v1029_v35 = vld [vmem:[%s2155_s2 + $0x128] sm:$0xff]  ;;  %v996_v38 = vld [vmem:[%s2155_s2 + $0x20] sm:$0xff] }
  0x29   :  { %1496 = vmatmul.mubr.msk.f32.gmra.mrb[18].mxu0 %vm215_vm1, %v169_v39  ;;  %1544 = vmatmul.mubr.msk.f32.gmra.mrb[18].mxu1 %vm215_vm1, %v201_v40  ;;  %v1028_v39 = vld [vmem:[%s2155_s2 + $0x120] sm:$0xff] }
  0x2a   :  { %1498 = vmatprep.mubr.msk.f32.mxu0 %vm215_vm1, %v170_v41  ;;  %1546 = vmatprep.mubr.msk.f32.mxu1 %vm215_vm1, %v202_v42 }
  0x2d   :  { %1499 = vmatmul.mubr.msk.f32.gmra.mrb[20].mxu0 %vm215_vm1, %v171_v43  ;;  %1547 = vmatmul.mubr.msk.f32.gmra.mrb[20].mxu1 %vm215_vm1, %v203_v44 }
  0x2e   :  { %1501 = vmatprep.mubr.msk.f32.mxu0 %vm215_vm1, %v172_v45  ;;  %1549 = vmatprep.mubr.msk.f32.mxu1 %vm215_vm1, %v204_v46 }
  0x31   :  { %1502 = vmatmul.mubr.msk.f32.gmra.mrb[22].mxu0 %vm215_vm1, %v173_v47  ;;  %1550 = vmatmul.mubr.msk.f32.gmra.mrb[22].mxu1 %vm215_vm1, %v205_v48 }
  0x32   :  { %1504 = vmatprep.mubr.msk.f32.mxu0 %vm215_vm1, %v174_v49  ;;  %1552 = vmatprep.mubr.msk.f32.mxu1 %vm215_vm1, %v206_v50 }
  0x35   :  { %1505 = vmatmul.mubr.msk.f32.gmra.mrb[24].mxu0 %vm215_vm1, %v175_v51  ;;  %1553 = vmatmul.mubr.msk.f32.gmra.mrb[24].mxu1 %vm215_vm1, %v207_v52 }
  0x36   :  { %1507 = vmatprep.mubr.msk.f32.mxu0 %vm215_vm1, %v176_v53  ;;  %1555 = vmatprep.mubr.msk.f32.mxu1 %vm215_vm1, %v208_v54  ;;  %v999_v54 = vld [vmem:[%s2155_s2 + $0x38] sm:$0xff] }
  0x39   :  { %1508 = vmatmul.mubr.msk.f32.gmra.mrb[26].mxu0 %vm215_vm1, %v177_v55  ;;  %1556 = vmatmul.mubr.msk.f32.gmra.mrb[26].mxu1 %vm215_vm1, %v209_v56  ;;  %v1031_v55 = vld [vmem:[%s2155_s2 + $0x138] sm:$0xff] }
  0x3a   :  { %1510 = vmatprep.mubr.msk.f32.mxu0 %vm215_vm1, %v178_v57  ;;  %1558 = vmatprep.mubr.msk.f32.mxu1 %vm215_vm1, %v210_v58  ;;  %v998_v58 = vld [vmem:[%s2155_s2 + $0x30] sm:$0xff] }
  0x3d   :  { %1511 = vmatmul.mubr.msk.f32.gmra.mrb[28].mxu0 %vm215_vm1, %v179_v59  ;;  %1559 = vmatmul.mubr.msk.f32.gmra.mrb[28].mxu1 %vm215_vm1, %v211_v60  ;;  %v1030_v59 = vld [vmem:[%s2155_s2 + $0x130] sm:$0xff] }
  0x3e   :  { %1513 = vmatprep.mubr.msk.f32.mxu0 %vm215_vm1, %v180_v61  ;;  %1561 = vmatprep.mubr.msk.f32.mxu1 %vm215_vm1, %v212_v62 }
  0x41   :  { %1514 = vmatmul.mubr.msk.f32.gmra.mrb[30].mxu0 %vm215_vm1, %v181_v63  ;;  %1562 = vmatmul.mubr.msk.f32.gmra.mrb[30].mxu1 %vm215_vm1, %v213_v0 }
  0xd8   :  { %v1470_v5 = vpop.f32.mrb[0].mxu0  ;;  %v1518_v7 = vpop.f32.mrb[0].mxu1 }
  0xd9   :  { %v1057_v8 = vadd.f32 %v1470_v5, %v993_v1  ;;  %v1089_v9 = vadd.f32 %v1518_v7, %v1025_v2  ;;  %v478_v10 = vpop.f32.mrb[1].mxu0  ;;  %v638_v11 = vpop.f32.mrb[1].mxu1 }
  0xda   :  { %v1056_v12 = vadd.f32 %v992_v3, %v478_v10  ;;  %v1088_v13 = vadd.f32 %v1024_v4, %v638_v11  ;;  %v1001_v11 = vld [vmem:[%s2155_s2 + $0x48] sm:$0xff] }
  0xdb   :  { %v1128_v16 = vadd.f32 %v1895_v6, %v1057_v8  ;;  %v1160_v17 = vadd.f32 %v1895_v6, %v1089_v9 }
  0xdc   :  { %v1127_v20 = vadd.f32 %v1895_v6, %v1056_v12  ;;  %v1159_v21 = vadd.f32 %v1895_v6, %v1088_v13  ;;  %v1473_v22 = vpop.f32.mrb[2].mxu0  ;;  %v1521_v23 = vpop.f32.mrb[2].mxu1  ;;  %v1033_v12 = vld [vmem:[%s2155_s2 + $0x148] sm:$0xff] }
  0xdd   :  { %v1192_v24 = vmax.f32 %v1128_v16, 0.0  ;;  %v1224_v25 = vmax.f32 %v1160_v17, 0.0  ;;  %v1059_v26 = vadd.f32 %v1473_v22, %v995_v14  ;;  %v1091_v27 = vadd.f32 %v1521_v23, %v1027_v15  ;;  %v488_v28 = vpop.f32.mrb[3].mxu0  ;;  %v648_v29 = vpop.f32.mrb[3].mxu1  ;;  %v1000_v15 = vld [vmem:[%s2155_s2 + $0x40] sm:$0xff] }
  0xde   :  { %v1191_v30 = vmax.f32 %v1127_v20, 0.0  ;;  %v1223_v31 = vmax.f32 %v1159_v21, 0.0  ;;  %v1058_v32 = vadd.f32 %v994_v18, %v488_v28  ;;  %v1090_v33 = vadd.f32 %v1026_v19, %v648_v29  ;;  %v1032_v16 = vld [vmem:[%s2155_s2 + $0x140] sm:$0xff] }
  0xdf   :  { %1256 = vst [vmem:[#allocation3 + $0x8] sm:$0xff] %v1192_v24  ;;  %1288 = vst [vmem:[#allocation3 + $0x108] sm:$0xff] %v1224_v25  ;;  %v1130_v36 = vadd.f32 %v1895_v6, %v1059_v26  ;;  %v1162_v37 = vadd.f32 %v1895_v6, %v1091_v27 }
  0xe0   :  { %1255 = vst [vmem:[#allocation3] sm:$0xff] %v1191_v30  ;;  %1287 = vst [vmem:[#allocation3 + $0x100] sm:$0xff] %v1223_v31  ;;  %v1129_v40 = vadd.f32 %v1895_v6, %v1058_v32  ;;  %v1161_v41 = vadd.f32 %v1895_v6, %v1090_v33  ;;  %v1476_v42 = vpop.f32.mrb[4].mxu0  ;;  %v1524_v43 = vpop.f32.mrb[4].mxu1  ;;  %v1003_v31 = vld [vmem:[%s2155_s2 + $0x58] sm:$0xff] }
  0xe1   :  { %v1194_v44 = vmax.f32 %v1130_v36, 0.0  ;;  %v1226_v45 = vmax.f32 %v1162_v37, 0.0  ;;  %v1061_v46 = vadd.f32 %v1476_v42, %v997_v34  ;;  %v1093_v47 = vadd.f32 %v1524_v43, %v1029_v35  ;;  %v498_v48 = vpop.f32.mrb[5].mxu0  ;;  %v658_v49 = vpop.f32.mrb[5].mxu1  ;;  %v1035_v32 = vld [vmem:[%s2155_s2 + $0x158] sm:$0xff]  ;;  %v1002_v35 = vld [vmem:[%s2155_s2 + $0x50] sm:$0xff] }
  0xe2   :  { %v1193_v50 = vmax.f32 %v1129_v40, 0.0  ;;  %v1225_v51 = vmax.f32 %v1161_v41, 0.0  ;;  %v1060_v52 = vadd.f32 %v996_v38, %v498_v48  ;;  %v1092_v53 = vadd.f32 %v1028_v39, %v658_v49  ;;  %v1034_v36 = vld [vmem:[%s2155_s2 + $0x150] sm:$0xff] }
  0xe3   :  { %1258 = vst [vmem:[#allocation3 + $0x18] sm:$0xff] %v1194_v44  ;;  %1290 = vst [vmem:[#allocation3 + $0x118] sm:$0xff] %v1226_v45  ;;  %v1132_v56 = vadd.f32 %v1895_v6, %v1061_v46  ;;  %v1164_v57 = vadd.f32 %v1895_v6, %v1093_v47 }
  0xe4   :  { %1257 = vst [vmem:[#allocation3 + $0x10] sm:$0xff] %v1193_v50  ;;  %1289 = vst [vmem:[#allocation3 + $0x110] sm:$0xff] %v1225_v51  ;;  %v1131_v60 = vadd.f32 %v1895_v6, %v1060_v52  ;;  %v1163_v61 = vadd.f32 %v1895_v6, %v1092_v53  ;;  %v1479_v62 = vpop.f32.mrb[6].mxu0  ;;  %v1527_v63 = vpop.f32.mrb[6].mxu1  ;;  %v1005_v51 = vld [vmem:[%s2155_s2 + $0x68] sm:$0xff] }
  0xe5   :  { %v1196_v0 = vmax.f32 %v1132_v56, 0.0  ;;  %v1228_v1 = vmax.f32 %v1164_v57, 0.0  ;;  %v1063_v2 = vadd.f32 %v1479_v62, %v999_v54  ;;  %v1095_v3 = vadd.f32 %v1527_v63, %v1031_v55  ;;  %v508_v4 = vpop.f32.mrb[7].mxu0  ;;  %v668_v5 = vpop.f32.mrb[7].mxu1  ;;  %v1037_v52 = vld [vmem:[%s2155_s2 + $0x168] sm:$0xff]  ;;  %v1004_v55 = vld [vmem:[%s2155_s2 + $0x60] sm:$0xff] }
  0xe6   :  { %v1195_v7 = vmax.f32 %v1131_v60, 0.0  ;;  %v1227_v8 = vmax.f32 %v1163_v61, 0.0  ;;  %v1062_v9 = vadd.f32 %v998_v58, %v508_v4  ;;  %v1094_v10 = vadd.f32 %v1030_v59, %v668_v5  ;;  %v1036_v56 = vld [vmem:[%s2155_s2 + $0x160] sm:$0xff] }
  0xe7   :  { %1260 = vst [vmem:[#allocation3 + $0x28] sm:$0xff] %v1196_v0  ;;  %1292 = vst [vmem:[#allocation3 + $0x128] sm:$0xff] %v1228_v1  ;;  %v1134_v13 = vadd.f32 %v1895_v6, %v1063_v2  ;;  %v1166_v14 = vadd.f32 %v1895_v6, %v1095_v3 }
  0xe8   :  { %1259 = vst [vmem:[#allocation3 + $0x20] sm:$0xff] %v1195_v7  ;;  %1291 = vst [vmem:[#allocation3 + $0x120] sm:$0xff] %v1227_v8  ;;  %v1133_v17 = vadd.f32 %v1895_v6, %v1062_v9  ;;  %v1165_v18 = vadd.f32 %v1895_v6, %v1094_v10  ;;  %v1482_v19 = vpop.f32.mrb[8].mxu0  ;;  %v1530_v20 = vpop.f32.mrb[8].mxu1  ;;  %v1007_v8 = vld [vmem:[%s2155_s2 + $0x78] sm:$0xff] }
  0xe9   :  { %v1198_v21 = vmax.f32 %v1134_v13, 0.0  ;;  %v1230_v22 = vmax.f32 %v1166_v14, 0.0  ;;  %v1065_v23 = vadd.f32 %v1482_v19, %v1001_v11  ;;  %v1097_v24 = vadd.f32 %v1530_v20, %v1033_v12  ;;  %v518_v25 = vpop.f32.mrb[9].mxu0  ;;  %v678_v26 = vpop.f32.mrb[9].mxu1  ;;  %v1039_v9 = vld [vmem:[%s2155_s2 + $0x178] sm:$0xff]  ;;  %v1006_v12 = vld [vmem:[%s2155_s2 + $0x70] sm:$0xff] }
  0xea   :  { %v1197_v27 = vmax.f32 %v1133_v17, 0.0  ;;  %v1229_v28 = vmax.f32 %v1165_v18, 0.0  ;;  %v1064_v29 = vadd.f32 %v1000_v15, %v518_v25  ;;  %v1096_v30 = vadd.f32 %v1032_v16, %v678_v26  ;;  %v1038_v13 = vld [vmem:[%s2155_s2 + $0x170] sm:$0xff] }
  0xeb   :  { %1262 = vst [vmem:[#allocation3 + $0x38] sm:$0xff] %v1198_v21  ;;  %1294 = vst [vmem:[#allocation3 + $0x138] sm:$0xff] %v1230_v22  ;;  %v1136_v33 = vadd.f32 %v1895_v6, %v1065_v23  ;;  %v1168_v34 = vadd.f32 %v1895_v6, %v1097_v24 }
  0xec   :  { %1261 = vst [vmem:[#allocation3 + $0x30] sm:$0xff] %v1197_v27  ;;  %1293 = vst [vmem:[#allocation3 + $0x130] sm:$0xff] %v1229_v28  ;;  %v1135_v37 = vadd.f32 %v1895_v6, %v1064_v29  ;;  %v1167_v38 = vadd.f32 %v1895_v6, %v1096_v30  ;;  %v1485_v39 = vpop.f32.mrb[10].mxu0  ;;  %v1533_v40 = vpop.f32.mrb[10].mxu1  ;;  %v1009_v28 = vld [vmem:[%s2155_s2 + $0x88] sm:$0xff] }
  0xed   :  { %v1200_v41 = vmax.f32 %v1136_v33, 0.0  ;;  %v1232_v42 = vmax.f32 %v1168_v34, 0.0  ;;  %v1067_v43 = vadd.f32 %v1485_v39, %v1003_v31  ;;  %v1099_v44 = vadd.f32 %v1533_v40, %v1035_v32  ;;  %v528_v45 = vpop.f32.mrb[11].mxu0  ;;  %v688_v46 = vpop.f32.mrb[11].mxu1  ;;  %v1041_v29 = vld [vmem:[%s2155_s2 + $0x188] sm:$0xff]  ;;  %v1008_v32 = vld [vmem:[%s2155_s2 + $0x80] sm:$0xff] }
  0xee   :  { %v1199_v47 = vmax.f32 %v1135_v37, 0.0  ;;  %v1231_v48 = vmax.f32 %v1167_v38, 0.0  ;;  %v1066_v49 = vadd.f32 %v1002_v35, %v528_v45  ;;  %v1098_v50 = vadd.f32 %v1034_v36, %v688_v46  ;;  %v1040_v33 = vld [vmem:[%s2155_s2 + $0x180] sm:$0xff] }
  0xef   :  { %1264 = vst [vmem:[#allocation3 + $0x48] sm:$0xff] %v1200_v41  ;;  %1296 = vst [vmem:[#allocation3 + $0x148] sm:$0xff] %v1232_v42  ;;  %v1138_v53 = vadd.f32 %v1895_v6, %v1067_v43  ;;  %v1170_v54 = vadd.f32 %v1895_v6, %v1099_v44 }
  0xf0   :  { %1263 = vst [vmem:[#allocation3 + $0x40] sm:$0xff] %v1199_v47  ;;  %1295 = vst [vmem:[#allocation3 + $0x140] sm:$0xff] %v1231_v48  ;;  %v1137_v57 = vadd.f32 %v1895_v6, %v1066_v49  ;;  %v1169_v58 = vadd.f32 %v1895_v6, %v1098_v50  ;;  %v1488_v59 = vpop.f32.mrb[12].mxu0  ;;  %v1536_v60 = vpop.f32.mrb[12].mxu1  ;;  %v1011_v48 = vld [vmem:[%s2155_s2 + $0x98] sm:$0xff] }
  0xf1   :  { %v1202_v61 = vmax.f32 %v1138_v53, 0.0  ;;  %v1234_v62 = vmax.f32 %v1170_v54, 0.0  ;;  %v1069_v63 = vadd.f32 %v1488_v59, %v1005_v51  ;;  %v1101_v0 = vadd.f32 %v1536_v60, %v1037_v52  ;;  %v538_v1 = vpop.f32.mrb[13].mxu0  ;;  %v698_v2 = vpop.f32.mrb[13].mxu1  ;;  %v1043_v49 = vld [vmem:[%s2155_s2 + $0x198] sm:$0xff]  ;;  %v1010_v52 = vld [vmem:[%s2155_s2 + $0x90] sm:$0xff] }
  0xf2   :  { %v1201_v3 = vmax.f32 %v1137_v57, 0.0  ;;  %v1233_v4 = vmax.f32 %v1169_v58, 0.0  ;;  %v1068_v5 = vadd.f32 %v1004_v55, %v538_v1  ;;  %v1100_v7 = vadd.f32 %v1036_v56, %v698_v2  ;;  %v1042_v53 = vld [vmem:[%s2155_s2 + $0x190] sm:$0xff] }
  0xf3   :  { %1266 = vst [vmem:[#allocation3 + $0x58] sm:$0xff] %v1202_v61  ;;  %1298 = vst [vmem:[#allocation3 + $0x158] sm:$0xff] %v1234_v62  ;;  %v1140_v10 = vadd.f32 %v1895_v6, %v1069_v63  ;;  %v1172_v11 = vadd.f32 %v1895_v6, %v1101_v0 }
  0xf4   :  { %1265 = vst [vmem:[#allocation3 + $0x50] sm:$0xff] %v1201_v3  ;;  %1297 = vst [vmem:[#allocation3 + $0x150] sm:$0xff] %v1233_v4  ;;  %v1139_v14 = vadd.f32 %v1895_v6, %v1068_v5  ;;  %v1171_v15 = vadd.f32 %v1895_v6, %v1100_v7  ;;  %v1491_v16 = vpop.f32.mrb[14].mxu0  ;;  %v1539_v17 = vpop.f32.mrb[14].mxu1  ;;  %v1013_v4 = vld [vmem:[%s2155_s2 + $0xa8] sm:$0xff] }
  0xf5   :  { %v1204_v18 = vmax.f32 %v1140_v10, 0.0  ;;  %v1236_v19 = vmax.f32 %v1172_v11, 0.0  ;;  %v1071_v20 = vadd.f32 %v1491_v16, %v1007_v8  ;;  %v1103_v21 = vadd.f32 %v1539_v17, %v1039_v9  ;;  %v548_v22 = vpop.f32.mrb[15].mxu0  ;;  %v708_v23 = vpop.f32.mrb[15].mxu1  ;;  %v1045_v5 = vld [vmem:[%s2155_s2 + $0x1a8] sm:$0xff]  ;;  %v1012_v9 = vld [vmem:[%s2155_s2 + $0xa0] sm:$0xff] }
  0xf6   :  { %v1203_v24 = vmax.f32 %v1139_v14, 0.0  ;;  %v1235_v25 = vmax.f32 %v1171_v15, 0.0  ;;  %v1070_v26 = vadd.f32 %v1006_v12, %v548_v22  ;;  %v1102_v27 = vadd.f32 %v1038_v13, %v708_v23  ;;  %v1044_v10 = vld [vmem:[%s2155_s2 + $0x1a0] sm:$0xff] }
  0xf7   :  { %1268 = vst [vmem:[#allocation3 + $0x68] sm:$0xff] %v1204_v18  ;;  %1300 = vst [vmem:[#allocation3 + $0x168] sm:$0xff] %v1236_v19  ;;  %v1142_v30 = vadd.f32 %v1895_v6, %v1071_v20  ;;  %v1174_v31 = vadd.f32 %v1895_v6, %v1103_v21 }
  0xf8   :  { %1267 = vst [vmem:[#allocation3 + $0x60] sm:$0xff] %v1203_v24  ;;  %1299 = vst [vmem:[#allocation3 + $0x160] sm:$0xff] %v1235_v25  ;;  %v1141_v34 = vadd.f32 %v1895_v6, %v1070_v26  ;;  %v1173_v35 = vadd.f32 %v1895_v6, %v1102_v27  ;;  %v1494_v36 = vpop.f32.mrb[16].mxu0  ;;  %v1542_v37 = vpop.f32.mrb[16].mxu1  ;;  %v1015_v25 = vld [vmem:[%s2155_s2 + $0xb8] sm:$0xff] }
  0xf9   :  { %v1206_v38 = vmax.f32 %v1142_v30, 0.0  ;;  %v1238_v39 = vmax.f32 %v1174_v31, 0.0  ;;  %v1073_v40 = vadd.f32 %v1494_v36, %v1009_v28  ;;  %v1105_v41 = vadd.f32 %v1542_v37, %v1041_v29  ;;  %v558_v42 = vpop.f32.mrb[17].mxu0  ;;  %v718_v43 = vpop.f32.mrb[17].mxu1  ;;  %v1047_v26 = vld [vmem:[%s2155_s2 + $0x1b8] sm:$0xff]  ;;  %v1014_v29 = vld [vmem:[%s2155_s2 + $0xb0] sm:$0xff] }
  0xfa   :  { %v1205_v44 = vmax.f32 %v1141_v34, 0.0  ;;  %v1237_v45 = vmax.f32 %v1173_v35, 0.0  ;;  %v1072_v46 = vadd.f32 %v1008_v32, %v558_v42  ;;  %v1104_v47 = vadd.f32 %v1040_v33, %v718_v43  ;;  %v1046_v30 = vld [vmem:[%s2155_s2 + $0x1b0] sm:$0xff] }
  0xfb   :  { %1270 = vst [vmem:[#allocation3 + $0x78] sm:$0xff] %v1206_v38  ;;  %1302 = vst [vmem:[#allocation3 + $0x178] sm:$0xff] %v1238_v39  ;;  %v1144_v50 = vadd.f32 %v1895_v6, %v1073_v40  ;;  %v1176_v51 = vadd.f32 %v1895_v6, %v1105_v41 }
  0xfc   :  { %1269 = vst [vmem:[#allocation3 + $0x70] sm:$0xff] %v1205_v44  ;;  %1301 = vst [vmem:[#allocation3 + $0x170] sm:$0xff] %v1237_v45  ;;  %v1143_v54 = vadd.f32 %v1895_v6, %v1072_v46  ;;  %v1175_v55 = vadd.f32 %v1895_v6, %v1104_v47  ;;  %v1497_v56 = vpop.f32.mrb[18].mxu0  ;;  %v1545_v57 = vpop.f32.mrb[18].mxu1  ;;  %v1017_v45 = vld [vmem:[%s2155_s2 + $0xc8] sm:$0xff] }
  0xfd   :  { %v1208_v58 = vmax.f32 %v1144_v50, 0.0  ;;  %v1240_v59 = vmax.f32 %v1176_v51, 0.0  ;;  %v1075_v60 = vadd.f32 %v1497_v56, %v1011_v48  ;;  %v1107_v61 = vadd.f32 %v1545_v57, %v1043_v49  ;;  %v568_v62 = vpop.f32.mrb[19].mxu0  ;;  %v728_v63 = vpop.f32.mrb[19].mxu1  ;;  %v1049_v46 = vld [vmem:[%s2155_s2 + $0x1c8] sm:$0xff]  ;;  %v1016_v49 = vld [vmem:[%s2155_s2 + $0xc0] sm:$0xff] }
  0xfe   :  { %v1207_v0 = vmax.f32 %v1143_v54, 0.0  ;;  %v1239_v1 = vmax.f32 %v1175_v55, 0.0  ;;  %v1074_v2 = vadd.f32 %v1010_v52, %v568_v62  ;;  %v1106_v3 = vadd.f32 %v1042_v53, %v728_v63  ;;  %v1048_v50 = vld [vmem:[%s2155_s2 + $0x1c0] sm:$0xff] }
  0xff   :  { %1272 = vst [vmem:[#allocation3 + $0x88] sm:$0xff] %v1208_v58  ;;  %1304 = vst [vmem:[#allocation3 + $0x188] sm:$0xff] %v1240_v59  ;;  %v1146_v7 = vadd.f32 %v1895_v6, %v1075_v60  ;;  %v1178_v8 = vadd.f32 %v1895_v6, %v1107_v61 }
 0x100   :  { %1271 = vst [vmem:[#allocation3 + $0x80] sm:$0xff] %v1207_v0  ;;  %1303 = vst [vmem:[#allocation3 + $0x180] sm:$0xff] %v1239_v1  ;;  %v1145_v11 = vadd.f32 %v1895_v6, %v1074_v2  ;;  %v1177_v12 = vadd.f32 %v1895_v6, %v1106_v3  ;;  %v1500_v13 = vpop.f32.mrb[20].mxu0  ;;  %v1548_v14 = vpop.f32.mrb[20].mxu1  ;;  %v1019_v1 = vld [vmem:[%s2155_s2 + $0xd8] sm:$0xff] }
 0x101   :  { %v1210_v15 = vmax.f32 %v1146_v7, 0.0  ;;  %v1242_v16 = vmax.f32 %v1178_v8, 0.0  ;;  %v1077_v17 = vadd.f32 %v1500_v13, %v1013_v4  ;;  %v1109_v18 = vadd.f32 %v1548_v14, %v1045_v5  ;;  %v578_v19 = vpop.f32.mrb[21].mxu0  ;;  %v738_v20 = vpop.f32.mrb[21].mxu1  ;;  %v1051_v2 = vld [vmem:[%s2155_s2 + $0x1d8] sm:$0xff]  ;;  %v1018_v5 = vld [vmem:[%s2155_s2 + $0xd0] sm:$0xff] }
 0x102   :  { %v1209_v21 = vmax.f32 %v1145_v11, 0.0  ;;  %v1241_v22 = vmax.f32 %v1177_v12, 0.0  ;;  %v1076_v23 = vadd.f32 %v1012_v9, %v578_v19  ;;  %v1108_v24 = vadd.f32 %v1044_v10, %v738_v20  ;;  %v1050_v7 = vld [vmem:[%s2155_s2 + $0x1d0] sm:$0xff] }
 0x103   :  { %1274 = vst [vmem:[#allocation3 + $0x98] sm:$0xff] %v1210_v15  ;;  %1306 = vst [vmem:[#allocation3 + $0x198] sm:$0xff] %v1242_v16  ;;  %v1148_v27 = vadd.f32 %v1895_v6, %v1077_v17  ;;  %v1180_v28 = vadd.f32 %v1895_v6, %v1109_v18 }
 0x104   :  { %1273 = vst [vmem:[#allocation3 + $0x90] sm:$0xff] %v1209_v21  ;;  %1305 = vst [vmem:[#allocation3 + $0x190] sm:$0xff] %v1241_v22  ;;  %v1147_v31 = vadd.f32 %v1895_v6, %v1076_v23  ;;  %v1179_v32 = vadd.f32 %v1895_v6, %v1108_v24  ;;  %v1503_v33 = vpop.f32.mrb[22].mxu0  ;;  %v1551_v34 = vpop.f32.mrb[22].mxu1  ;;  %v1021_v22 = vld [vmem:[%s2155_s2 + $0xe8] sm:$0xff] }
 0x105   :  { %v1212_v35 = vmax.f32 %v1148_v27, 0.0  ;;  %v1244_v36 = vmax.f32 %v1180_v28, 0.0  ;;  %v1079_v37 = vadd.f32 %v1503_v33, %v1015_v25  ;;  %v1111_v38 = vadd.f32 %v1551_v34, %v1047_v26  ;;  %v588_v39 = vpop.f32.mrb[23].mxu0  ;;  %v748_v40 = vpop.f32.mrb[23].mxu1  ;;  %v1053_v23 = vld [vmem:[%s2155_s2 + $0x1e8] sm:$0xff]  ;;  %v1020_v26 = vld [vmem:[%s2155_s2 + $0xe0] sm:$0xff] }
 0x106   :  { %v1211_v41 = vmax.f32 %v1147_v31, 0.0  ;;  %v1243_v42 = vmax.f32 %v1179_v32, 0.0  ;;  %v1078_v43 = vadd.f32 %v1014_v29, %v588_v39  ;;  %v1110_v44 = vadd.f32 %v1046_v30, %v748_v40  ;;  %v1052_v27 = vld [vmem:[%s2155_s2 + $0x1e0] sm:$0xff] }
 0x107   :  { %1276 = vst [vmem:[#allocation3 + $0xa8] sm:$0xff] %v1212_v35  ;;  %1308 = vst [vmem:[#allocation3 + $0x1a8] sm:$0xff] %v1244_v36  ;;  %v1150_v47 = vadd.f32 %v1895_v6, %v1079_v37  ;;  %v1182_v48 = vadd.f32 %v1895_v6, %v1111_v38 }
 0x108   :  { %1275 = vst [vmem:[#allocation3 + $0xa0] sm:$0xff] %v1211_v41  ;;  %1307 = vst [vmem:[#allocation3 + $0x1a0] sm:$0xff] %v1243_v42  ;;  %v1149_v51 = vadd.f32 %v1895_v6, %v1078_v43  ;;  %v1181_v52 = vadd.f32 %v1895_v6, %v1110_v44  ;;  %v1506_v53 = vpop.f32.mrb[24].mxu0  ;;  %v1554_v54 = vpop.f32.mrb[24].mxu1  ;;  %v1023_v42 = vld [vmem:[%s2155_s2 + $0xf8] sm:$0xff] }
 0x109   :  { %v1214_v55 = vmax.f32 %v1150_v47, 0.0  ;;  %v1246_v56 = vmax.f32 %v1182_v48, 0.0  ;;  %v1081_v57 = vadd.f32 %v1506_v53, %v1017_v45  ;;  %v1113_v58 = vadd.f32 %v1554_v54, %v1049_v46  ;;  %v598_v59 = vpop.f32.mrb[25].mxu0  ;;  %v758_v60 = vpop.f32.mrb[25].mxu1  ;;  %v1055_v43 = vld [vmem:[%s2155_s2 + $0x1f8] sm:$0xff]  ;;  %v1022_v46 = vld [vmem:[%s2155_s2 + $0xf0] sm:$0xff] }
 0x10a   :  { %v1213_v61 = vmax.f32 %v1149_v51, 0.0  ;;  %v1245_v62 = vmax.f32 %v1181_v52, 0.0  ;;  %v1080_v63 = vadd.f32 %v1016_v49, %v598_v59  ;;  %v1112_v0 = vadd.f32 %v1048_v50, %v758_v60  ;;  %v1054_v47 = vld [vmem:[%s2155_s2 + $0x1f0] sm:$0xff]  ;;  %s1324_s2 = sshll.u32 %s1593_s3, 4  ;;  %s1325_s2 = int_to_ptr.vmem [resolvable:$true] %s1324_s2 }
 0x10b   :  { %1278 = vst [vmem:[#allocation3 + $0xb8] sm:$0xff] %v1214_v55  ;;  %1310 = vst [vmem:[#allocation3 + $0x1b8] sm:$0xff] %v1246_v56  ;;  %v1152_v3 = vadd.f32 %v1895_v6, %v1081_v57  ;;  %v1184_v4 = vadd.f32 %v1895_v6, %v1113_v58  ;;  %s1569_s23 = scalar_lea.vmem %s1325_s2, 8192  ;;  %p1574_p1 = scmp.lt.s32.totalorder %s1325_s2, %s1325_s2 }
 0x10c   :  { %1277 = vst [vmem:[#allocation3 + $0xb0] sm:$0xff] %v1213_v61  ;;  %1309 = vst [vmem:[#allocation3 + $0x1b0] sm:$0xff] %v1245_v62  ;;  %v1151_v8 = vadd.f32 %v1895_v6, %v1080_v63  ;;  %v1183_v9 = vadd.f32 %v1895_v6, %v1112_v0  ;;  %v1509_v10 = vpop.f32.mrb[26].mxu0  ;;  %v1557_v11 = vpop.f32.mrb[26].mxu1  ;;  %p1570_p0 = scmp.ne.s32.totalorder %s1325_s2, %s1569_s23  ;;  %p1575_p2 = scmp.lt.s32.totalorder %s1569_s23, %s1569_s23 }
 0x10d   :  { %v1216_v12 = vmax.f32 %v1152_v3, 0.0  ;;  %v1248_v13 = vmax.f32 %v1184_v4, 0.0  ;;  %v1083_v14 = vadd.f32 %v1509_v10, %v1019_v1  ;;  %v1115_v15 = vadd.f32 %v1557_v11, %v1051_v2  ;;  %v608_v16 = vpop.f32.mrb[27].mxu0  ;;  %v768_v17 = vpop.f32.mrb[27].mxu1 }
 0x10e   :  { %v1215_v18 = vmax.f32 %v1151_v8, 0.0  ;;  %v1247_v19 = vmax.f32 %v1183_v9, 0.0  ;;  %v1082_v20 = vadd.f32 %v1018_v5, %v608_v16  ;;  %v1114_v21 = vadd.f32 %v1050_v7, %v768_v17  ;;  %p1576_p3 = por %p1575_p2, %p1574_p1 }
 0x10f   :  { %1280 = vst [vmem:[#allocation3 + $0xc8] sm:$0xff] %v1216_v12  ;;  %1312 = vst [vmem:[#allocation3 + $0x1c8] sm:$0xff] %v1248_v13  ;;  %v1154_v24 = vadd.f32 %v1895_v6, %v1083_v14  ;;  %v1186_v25 = vadd.f32 %v1895_v6, %v1115_v15 }
 0x110   :  { %1279 = vst [vmem:[#allocation3 + $0xc0] sm:$0xff] %v1215_v18  ;;  %1311 = vst [vmem:[#allocation3 + $0x1c0] sm:$0xff] %v1247_v19  ;;  %v1153_v28 = vadd.f32 %v1895_v6, %v1082_v20  ;;  %v1185_v29 = vadd.f32 %v1895_v6, %v1114_v21  ;;  %v1512_v30 = vpop.f32.mrb[28].mxu0  ;;  %v1560_v31 = vpop.f32.mrb[28].mxu1  ;;  %p1577_p4 = pnand %p1576_p3, %p1570_p0 }
 0x111   :  { %v1218_v32 = vmax.f32 %v1154_v24, 0.0  ;;  %v1250_v33 = vmax.f32 %v1186_v25, 0.0  ;;  %v1085_v34 = vadd.f32 %v1512_v30, %v1021_v22  ;;  %v1117_v35 = vadd.f32 %v1560_v31, %v1053_v23  ;;  %v618_v36 = vpop.f32.mrb[29].mxu0  ;;  %v778_v37 = vpop.f32.mrb[29].mxu1 }
 0x112   :  { %v1217_v38 = vmax.f32 %v1153_v28, 0.0  ;;  %v1249_v39 = vmax.f32 %v1185_v29, 0.0  ;;  %v1084_v40 = vadd.f32 %v1020_v26, %v618_v36  ;;  %v1116_v41 = vadd.f32 %v1052_v27, %v778_v37 }
 0x113   :  { %1282 = vst [vmem:[#allocation3 + $0xd8] sm:$0xff] %v1218_v32  ;;  %1314 = vst [vmem:[#allocation3 + $0x1d8] sm:$0xff] %v1250_v33  ;;  %v1156_v44 = vadd.f32 %v1895_v6, %v1085_v34  ;;  %v1188_v45 = vadd.f32 %v1895_v6, %v1117_v35 }
 0x114   :  { %1281 = vst [vmem:[#allocation3 + $0xd0] sm:$0xff] %v1217_v38  ;;  %1313 = vst [vmem:[#allocation3 + $0x1d0] sm:$0xff] %v1249_v39  ;;  %v1155_v48 = vadd.f32 %v1895_v6, %v1084_v40  ;;  %v1187_v49 = vadd.f32 %v1895_v6, %v1116_v41  ;;  %v1515_v50 = vpop.f32.mrb[30].mxu0  ;;  %v1563_v51 = vpop.f32.mrb[30].mxu1 }
 0x115   :  { %v1220_v52 = vmax.f32 %v1156_v44, 0.0  ;;  %v1252_v53 = vmax.f32 %v1188_v45, 0.0  ;;  %v1087_v54 = vadd.f32 %v1515_v50, %v1023_v42  ;;  %v1119_v55 = vadd.f32 %v1563_v51, %v1055_v43  ;;  %v628_v56 = vpop.f32.mrb[31].mxu0  ;;  %v788_v57 = vpop.f32.mrb[31].mxu1 }
 0x116   :  { %v1219_v58 = vmax.f32 %v1155_v48, 0.0  ;;  %v1251_v59 = vmax.f32 %v1187_v49, 0.0  ;;  %v1086_v60 = vadd.f32 %v1022_v46, %v628_v56  ;;  %v1118_v61 = vadd.f32 %v1054_v47, %v788_v57 }
 0x117   :  { %1284 = vst [vmem:[#allocation3 + $0xe8] sm:$0xff] %v1220_v52  ;;  %1316 = vst [vmem:[#allocation3 + $0x1e8] sm:$0xff] %v1252_v53  ;;  %v1158_v62 = vadd.f32 %v1895_v6, %v1087_v54  ;;  %v1190_v63 = vadd.f32 %v1895_v6, %v1119_v55 }
 0x118   :  { %1283 = vst [vmem:[#allocation3 + $0xe0] sm:$0xff] %v1219_v58  ;;  %1315 = vst [vmem:[#allocation3 + $0x1e0] sm:$0xff] %v1251_v59  ;;  %v1157_v0 = vadd.f32 %v1895_v6, %v1086_v60  ;;  %v1189_v1 = vadd.f32 %v1895_v6, %v1118_v61 }
 0x119   :  { %v1222_v2 = vmax.f32 %v1158_v62, 0.0  ;;  %v1254_v3 = vmax.f32 %v1190_v63, 0.0 }
 0x11a   :  { %v1221_v4 = vmax.f32 %v1157_v0, 0.0  ;;  %v1253_v5 = vmax.f32 %v1189_v1, 0.0 }
 0x11b   :  { %1286 = vst [vmem:[#allocation3 + $0xf8] sm:$0xff] %v1222_v2  ;;  %1318 = vst [vmem:[#allocation3 + $0x1f8] sm:$0xff] %v1254_v3 }
 0x11c   :  { %1285 = vst [vmem:[#allocation3 + $0xf0] sm:$0xff] %v1221_v4  ;;  %1317 = vst [vmem:[#allocation3 + $0x1f0] sm:$0xff] %v1253_v5 }
 0x11d   :  { %1580 = shalt.err (!%p1577_p4)
}
 0x11e   :  { %s1581_s25 = scalar_lea.hbm %s2157_s4, 8192 }
 0x11f   :  { %p1582_p5 = scmp.ne.s32.totalorder %s2157_s4, %s1581_s25  ;;  %p1585_p6 = scmp.lt.u32.totalorder %s1581_s25, %s2157_s4 }
 0x121   :  { %p1587_p7 = pnand %p1585_p6, %p1582_p5 }
 0x123   :  { %1590 = shalt.err (!%p1587_p7)
}
 0x124   :  { %s1594_s30 = smov 128   ;;  %s1595_s5 = smov 8  }
 0x125   :  { %1330 = dma.vmem_to_hbm [thread:$0]  %s1325_s2, 8192, %s2157_s4, [#allocation4], %s1594_s30, %s1594_s30, %s1595_s5  }
 0x126   :  { %1591 = dma.done.wait [#allocation4], 8192  }
 0x127   :  { %1592 = vsyncadd [#allocation4], 4294959104 }
 0x128   :  { %1334 = vsyncpa [#allocation4], 1 }

</bundles_post_ra>
